<compile_context>
chip_gen: v5e
topology: v5e:2x2
jax: 0.10.0
libtpu: 0.0.40
codegen_flags: <defaults>
</compile_context>

<pallas_src>
import functools

import jax
import jax.numpy as jnp
from jax.experimental import pallas as pl
from jax.experimental.pallas import tpu as pltpu


def _se_kernel(x_ref, w1_ref, b1_ref, w2_ref, b2_ref, o_ref, *, inv_hw):
    """One grid step processes a (Nb, C, HW) slab.

    x_ref : (Nb, C, HW)  f32 or bf16
    w1_ref: (C, mip) f32   conv1 weight, pre-transposed (no in-kernel .T)
    b1_ref: (1, mip) f32
    w2_ref: (mip, C) f32   conv2 weight, pre-transposed
    b2_ref: (1, C)  f32
    o_ref : (Nb, C, HW)  same dtype as x
    """
    # Global average pool; accumulate in f32 without keeping a full-block f32
    # copy of x live for the rest of the kernel.
    pooled = jnp.sum(x_ref[...], axis=2, dtype=jnp.float32) * inv_hw      # (Nb, C)

    # 1x1 conv #1 (C -> mip) + ReLU   (weights pre-transposed: no XLU transpose)
    h = jnp.dot(pooled, w1_ref[...],
                preferred_element_type=jnp.float32) + b1_ref[...]         # (Nb, mip)
    h = jnp.maximum(h, 0.0)

    # 1x1 conv #2 (mip -> C) + sigmoid
    s = jnp.dot(h, w2_ref[...],
                preferred_element_type=jnp.float32) + b2_ref[...]         # (Nb, C)
    s = jax.nn.sigmoid(s)

    # Broadcast the per-channel scale over the spatial lane dim; multiply in x's
    # dtype (no second f32 upcast of the whole block) and store.
    o_ref[...] = x_ref[...] * s[:, :, None].astype(o_ref.dtype)


def _vmem_budgets():
    """Per-generation (scoped VMEM limit, per-block byte budget, physical VMEM)."""
    phys = None
    try:
        phys = int(pltpu.get_tpu_info().vmem_capacity_bytes)
    except Exception:
        phys = None
    if not phys or phys <= 0:
        phys = 64 * 1024 * 1024                 # conservative: v7x per-core VMEM
    # 48 MiB on v7x (64 MiB phys), 96 MiB on v5e/v6e (128 MiB phys).
    scoped = min(int(phys * 3 // 4), 96 * 1024 * 1024)
    # 2x input + 2x output double-buffers of one block must fit with headroom.
    block_budget = scoped // 6
    return scoped, block_budget, phys


def se_forward(x, w1, b1, w2, b2, *, block_n=None):
    """x: (N, C, H, W) f32 or bf16. w1: (mip, C), b1: (mip,), w2: (C, mip), b2: (C,)."""
    N, C, H, W = x.shape
    mip = w1.shape[0]
    HW = H * W
    itemsize = jnp.dtype(x.dtype).itemsize
    scoped_vmem, block_budget, phys_vmem = _vmem_budgets()

    # VMEM footprint of one sample's (C, HW) tile, including sublane/lane padding.
    sublane = 8 * (4 // itemsize)                               # 8 f32, 16 bf16
    c_pad = -(-C // sublane) * sublane
    hw_pad = -(-HW // 128) * 128
    sample_vmem = c_pad * hw_pad * itemsize

    if block_n is None:
        want = max(1, block_budget // sample_vmem)
        if N > 1:
            want = min(want, -(-N // 2))    # keep >= 2 grid steps (v7x megacore)
        want = min(want, N)
        # Largest divisor of N not exceeding `want`: exact tiling of the batch,
        # so no batch padding and no ragged last block is ever materialized.
        block_n = 1
        for d in range(int(want), 0, -1):
            if N % d == 0:
                block_n = d
                break
    grid_n = N // block_n

    # If even a single block's double-buffered in+out footprint exceeds the
    # default scoped limit, raise the limit toward physical VMEM (best effort;
    # no spatial tiling fallback here).
    needed = 4 * block_n * sample_vmem + (1 << 20)
    vmem_limit = scoped_vmem if needed <= scoped_vmem else min(needed, int(phys_vmem * 9 // 10))

    x2 = x.reshape(N, C, HW)                # free: NCHW is already contiguous

    # Pre-transpose the 1x1-conv weights outside the kernel (free on the XLA side).
    f32 = jnp.float32
    w1t = w1.astype(f32).T                  # (C, mip)
    w2t = w2.astype(f32).T                  # (mip, C)
    b1r = b1.astype(f32).reshape(1, mip)
    b2r = b2.astype(f32).reshape(1, C)

    kernel = functools.partial(_se_kernel, inv_hw=float(1.0 / HW))

    # Honest hint: this op is pure read+write HBM-bandwidth-bound.
    cost = pl.CostEstimate(
        flops=int(N * C * (2 * HW + 4 * mip)),
        transcendentals=int(N * C),
        bytes_accessed=int(2 * N * C * HW * itemsize + 4 * (2 * C * mip + C + mip)),
    )

    out = pl.pallas_call(
        kernel,
        out_shape=jax.ShapeDtypeStruct((N, C, HW), x.dtype),
        grid_spec=pltpu.PrefetchScalarGridSpec(
            num_scalar_prefetch=0,
            grid=(grid_n,),
            in_specs=[
                pl.BlockSpec((block_n, C, HW), lambda n: (n, 0, 0)),
                pl.BlockSpec((C, mip), lambda n: (0, 0)),
                pl.BlockSpec((1, mip), lambda n: (0, 0)),
                pl.BlockSpec((mip, C), lambda n: (0, 0)),
                pl.BlockSpec((1, C), lambda n: (0, 0)),
            ],
            out_specs=pl.BlockSpec((block_n, C, HW), lambda n: (n, 0, 0)),
        ),
        compiler_params=pltpu.CompilerParams(
            dimension_semantics=("parallel",),
            vmem_limit_bytes=int(vmem_limit),
        ),
        cost_estimate=cost,
    )(x2, w1t, b1r, w2t, b2r)

    return out.reshape(N, C, H, W)


def se_reference(x, w1, b1, w2, b2):
    """Pure-JAX reference (f32 math) matching the PyTorch SE forward."""
    xf = x.astype(jnp.float32)
    p = xf.mean(axis=(2, 3))                                  # (N, C)
    h = jnp.maximum(p @ w1.astype(jnp.float32).T + b1, 0.0)   # (N, mip)
    s = jax.nn.sigmoid(h @ w2.astype(jnp.float32).T + b2)     # (N, C)
    return xf * s[:, :, None, None]


if __name__ == "__main__":
    # Small shapes consistent with the module: planes=4, ratio=16 -> mip = max(8, 0) = 8
    N, C, H, W = 2, 4, 16, 16
    planes, ratio = C, 16
    mip = max(8, planes // ratio)

    key = jax.random.PRNGKey(0)
    kx, k1, k2, k3, k4 = jax.random.split(key, 5)
    x = jax.random.normal(kx, (N, C, H, W), dtype=jnp.float32)

    # Conv2d kernel_size=1 weights squeezed to 2-D.
    w1 = 0.1 * jax.random.normal(k1, (mip, planes), dtype=jnp.float32)
    b1 = 0.05 * jax.random.normal(k2, (mip,), dtype=jnp.float32)
    w2 = 0.1 * jax.random.normal(k3, (planes, mip), dtype=jnp.float32)
    b2 = 0.05 * jax.random.normal(k4, (planes,), dtype=jnp.float32)

    # f32 I/O
    out = se_forward(x, w1, b1, w2, b2)
    jax.block_until_ready(out)
    ref = se_reference(x, w1, b1, w2, b2)
    assert jnp.allclose(out, ref, atol=1e-5, rtol=1e-5), "f32 mismatch vs reference"

    # bf16 I/O (halves HBM traffic; scale math is still f32 inside the kernel)
    xb = x.astype(jnp.bfloat16)
    outb = se_forward(xb, w1, b1, w2, b2)
    jax.block_until_ready(outb)
    refb = se_reference(xb, w1, b1, w2, b2)
    assert jnp.allclose(outb.astype(jnp.float32), refb, atol=3e-2, rtol=3e-2), \
        "bf16 mismatch vs reference"

    # Exercise the non-128-multiple spatial path (HW=49) and an odd batch (N=3,
    # which tiles as block_n=1 / grid=3 with no padding).
    N2, C2, H2, W2 = 3, 16, 7, 7
    mip2 = max(8, C2 // 16)
    k5, k6, k7, k8, k9 = jax.random.split(jax.random.PRNGKey(1), 5)
    x3 = jax.random.normal(k5, (N2, C2, H2, W2), dtype=jnp.float32)
    w1b = 0.1 * jax.random.normal(k6, (mip2, C2), dtype=jnp.float32)
    b1b = 0.05 * jax.random.normal(k7, (mip2,), dtype=jnp.float32)
    w2b = 0.1 * jax.random.normal(k8, (C2, mip2), dtype=jnp.float32)
    b2b = 0.05 * jax.random.normal(k9, (C2,), dtype=jnp.float32)
    out3 = se_forward(x3, w1b, b1b, w2b, b2b)
    jax.block_until_ready(out3)
    ref3 = se_reference(x3, w1b, b1b, w2b, b2b)
    assert jnp.allclose(out3, ref3, atol=1e-5, rtol=1e-5), "odd-shape mismatch"

    print("KERNEL_OK")
</pallas_src>

<mosaic_0001>
module attributes {stable_mosaic.version = 11 : i64} {
  func.func @_se_kernel(%arg0: i32, %arg1: memref<1x4x256xf32, #tpu.memory_space<vmem>>, %arg2: memref<4x8xf32, #tpu.memory_space<vmem>>, %arg3: memref<1x8xf32, #tpu.memory_space<vmem>>, %arg4: memref<8x4xf32, #tpu.memory_space<vmem>>, %arg5: memref<1x4xf32, #tpu.memory_space<vmem>>, %arg6: memref<1x4x256xf32, #tpu.memory_space<vmem>>) attributes {dimension_semantics = [#tpu.dimension_semantics<parallel>], iteration_bounds = array<i64: 2>, scalar_prefetch = 0 : i64, scratch_operands = 0 : i64, tpu.core_type = #tpu.core_type<tc>, window_params = [{transform_indices = @transform_0, window_bounds = array<i64: 1, 4, 256>}, {pipeline_mode = #tpu.pipeline_mode<synchronous>, transform_indices = @transform_1, window_bounds = array<i64: 4, 8>}, {pipeline_mode = #tpu.pipeline_mode<synchronous>, transform_indices = @transform_2, window_bounds = array<i64: 1, 8>}, {pipeline_mode = #tpu.pipeline_mode<synchronous>, transform_indices = @transform_3, window_bounds = array<i64: 8, 4>}, {pipeline_mode = #tpu.pipeline_mode<synchronous>, transform_indices = @transform_4, window_bounds = array<i64: 1, 4>}, {transform_indices = @transform_5, window_bounds = array<i64: 1, 4, 256>}]} {
    %c0 = arith.constant 0 : index
    %c0_0 = arith.constant 0 : index
    %c0_1 = arith.constant 0 : index
    %0 = vector.load %arg1[%c0, %c0_0, %c0_1] : memref<1x4x256xf32, #tpu.memory_space<vmem>>, vector<1x4x256xf32>
    %cst = arith.constant dense<0.000000e+00> : vector<1x4xf32>
    %1 = vector.multi_reduction <add>, %0, %cst [2] : vector<1x4x256xf32> to vector<1x4xf32>
    %cst_2 = arith.constant 3.906250e-03 : f32
    %2 = vector.broadcast %cst_2 : f32 to vector<1x4xf32>
    %3 = arith.mulf %1, %2 : vector<1x4xf32>
    %c0_3 = arith.constant 0 : index
    %c0_4 = arith.constant 0 : index
    %4 = vector.load %arg2[%c0_3, %c0_4] : memref<4x8xf32, #tpu.memory_space<vmem>>, vector<4x8xf32>
    %cst_5 = arith.constant dense<0.000000e+00> : vector<1x8xf32>
    %5 = tpu.matmul %3, %4, %cst_5 {dimension_numbers = #tpu.dot_dimension_numbers<[1], [0], [0], [1], [0, 0, 1, 1], [], []>} : vector<1x4xf32>, vector<4x8xf32>, vector<1x8xf32> -> vector<1x8xf32>
    %c0_6 = arith.constant 0 : index
    %c0_7 = arith.constant 0 : index
    %6 = vector.load %arg3[%c0_6, %c0_7] : memref<1x8xf32, #tpu.memory_space<vmem>>, vector<1x8xf32>
    %7 = arith.addf %5, %6 : vector<1x8xf32>
    %cst_8 = arith.constant 0.000000e+00 : f32
    %8 = vector.broadcast %cst_8 : f32 to vector<1x8xf32>
    %9 = arith.maximumf %7, %8 : vector<1x8xf32>
    %c0_9 = arith.constant 0 : index
    %c0_10 = arith.constant 0 : index
    %10 = vector.load %arg4[%c0_9, %c0_10] : memref<8x4xf32, #tpu.memory_space<vmem>>, vector<8x4xf32>
    %cst_11 = arith.constant dense<0.000000e+00> : vector<1x4xf32>
    %11 = tpu.matmul %9, %10, %cst_11 {dimension_numbers = #tpu.dot_dimension_numbers<[1], [0], [0], [1], [0, 0, 1, 1], [], []>} : vector<1x8xf32>, vector<8x4xf32>, vector<1x4xf32> -> vector<1x4xf32>
    %c0_12 = arith.constant 0 : index
    %c0_13 = arith.constant 0 : index
    %12 = vector.load %arg5[%c0_12, %c0_13] : memref<1x4xf32, #tpu.memory_space<vmem>>, vector<1x4xf32>
    %13 = arith.addf %11, %12 : vector<1x4xf32>
    %14 = arith.negf %13 : vector<1x4xf32>
    %15 = math.exp %14 : vector<1x4xf32>
    %cst_14 = arith.constant 1.000000e+00 : f32
    %16 = vector.broadcast %cst_14 : f32 to vector<1x4xf32>
    %17 = arith.addf %16, %15 : vector<1x4xf32>
    %18 = arith.divf %16, %17 : vector<1x4xf32>
    %c0_15 = arith.constant 0 : index
    %c0_16 = arith.constant 0 : index
    %c0_17 = arith.constant 0 : index
    %19 = vector.load %arg1[%c0_15, %c0_16, %c0_17] : memref<1x4x256xf32, #tpu.memory_space<vmem>>, vector<1x4x256xf32>
    %20 = vector.shape_cast %18 : vector<1x4xf32> to vector<1x4x1xf32>
    %21 = vector.broadcast %20 : vector<1x4x1xf32> to vector<1x4x256xf32>
    %22 = arith.mulf %19, %21 : vector<1x4x256xf32>
    %c0_18 = arith.constant 0 : index
    %c0_19 = arith.constant 0 : index
    %c0_20 = arith.constant 0 : index
    %23 = vector.load %arg6[%c0_18, %c0_19, %c0_20] : memref<1x4x256xf32, #tpu.memory_space<vmem>>, vector<1x4x256xf32>
    tpu.vector_store %arg6[%c0_18, %c0_19, %c0_20], %22 {strides = array<i32>} : memref<1x4x256xf32, #tpu.memory_space<vmem>>, vector<1x4x256xf32>,
    return
  }
  func.func @transform_0(%arg0: i32) -> (i32, i32, i32) {
    %c0_i32 = arith.constant 0 : i32
    %c0_i32_0 = arith.constant 0 : i32
    %c0_i32_1 = arith.constant 0 : i32
    return %arg0, %c0_i32, %c0_i32_0 : i32, i32, i32
  }
  func.func @transform_1(%arg0: i32) -> (i32, i32) {
    %c0_i32 = arith.constant 0 : i32
    %c0_i32_0 = arith.constant 0 : i32
    %c0_i32_1 = arith.constant 0 : i32
    return %c0_i32, %c0_i32_0 : i32, i32
  }
  func.func @transform_2(%arg0: i32) -> (i32, i32) {
    %c0_i32 = arith.constant 0 : i32
    %c0_i32_0 = arith.constant 0 : i32
    %c0_i32_1 = arith.constant 0 : i32
    return %c0_i32, %c0_i32_0 : i32, i32
  }
  func.func @transform_3(%arg0: i32) -> (i32, i32) {
    %c0_i32 = arith.constant 0 : i32
    %c0_i32_0 = arith.constant 0 : i32
    %c0_i32_1 = arith.constant 0 : i32
    return %c0_i32, %c0_i32_0 : i32, i32
  }
  func.func @transform_4(%arg0: i32) -> (i32, i32) {
    %c0_i32 = arith.constant 0 : i32
    %c0_i32_0 = arith.constant 0 : i32
    %c0_i32_1 = arith.constant 0 : i32
    return %c0_i32, %c0_i32_0 : i32, i32
  }
  func.func @transform_5(%arg0: i32) -> (i32, i32, i32) {
    %c0_i32 = arith.constant 0 : i32
    %c0_i32_0 = arith.constant 0 : i32
    %c0_i32_1 = arith.constant 0 : i32
    return %arg0, %c0_i32, %c0_i32_0 : i32, i32, i32
  }
}

</mosaic_0001>

<bundles_post_ra>
// kernel: tpu_custom_call.1
= control target key start
LH: loop header
LB: loop body
LE: loop exit
PB: predicated region body
PF: predicated region fallthrough
CT: control target
= control target key end

     0   :  { %10 = vsyncpa [#allocation3], 0  ;;  %s781_s0 = inlined_call_operand.hbm [shape: f32[2,4,256], index: 0, kind: input, shape index: {}]   ;;  %s782_s1 = inlined_call_operand.vmem [shape: f32[4,8], index: 1, kind: input, shape index: {}]   ;;  %s783_s2 = inlined_call_operand.vmem [shape: f32[1,8], index: 2, kind: input, shape index: {}]   ;;  %s784_s3 = inlined_call_operand.vmem [shape: f32[8,4], index: 3, kind: input, shape index: {}]   ;;  %s785_s4 = inlined_call_operand.vmem [shape: f32[1,4], index: 4, kind: input, shape index: {}]   ;;  %s786_s5 = inlined_call_operand.hbm [shape: f32[2,4,256], index: 5, kind: output, shape index: {}]  }
   0x1   :  { %12 = vsyncpa [#allocation3 + $0x1], 0 }
   0x2   :  { %13 = vsyncpa [#allocation4], 0 }
   0x3   :  { %15 = vsyncpa [#allocation4 + $0x1], 0  ;;  %s638_s18 = smov 0   ;;  %s640_s19 = smov 0  }
   0x4   :  { %s642_s20 = smov 0   ;;  %s644_s21 = smov 0  }
   0x5 LB: > { %s659_s22 = sadd.s32 4294967295, %s605_s21   ;;  %s437_s23 = sadd.s32 4294967294, %s605_s21   ;;  %s605_s21 = sphi %s644_s21, %s796_s21   ;;  %s601_s20 = sphi %s642_s20, %s795_s20   ;;  %s597_s19 = sphi %s640_s19, %s794_s19   ;;  %s593_s18 = sphi %s638_s18, %s793_s18  }
   0x6   : > { %s663_s24 = sadd.s32 1, %s605_s21   ;;  %s28_s25 = sadd.s32 1, %s601_s20 }
   0x7   : > { %s25_s26 = ssub.s32 %s605_s21, %s663_s24  ;;  %p35_p0 = scmp.ne.s32.totalorder %s601_s20, %s597_s19 }
   0x8   : > { %p26_p1 = scmp.eq.s32.totalorder %s25_s26, 0  ;;  %p36_p2 = scmp.eq.s32.totalorder %s605_s21, 0 }
   0x9   : > { %p41_p3 = scmp.ne.s32.totalorder %s597_s19, %s593_s18  ;;  %p42_p4 = scmp.eq.s32.totalorder %s659_s22, 0 }
   0xa   : > { %s675_s27 = scalar_select %p26_p1, %s601_s20, %s28_s25  }
   0xb   : > { %p677_p5 = por %p36_p2, %p35_p0  ;;  %p681_p6 = por %p42_p4, %p41_p3 }
   0xc   : > { %p149_p7 = scmp.eq.s32.totalorder %s659_s22, 1  ;;  %p155_p8 = scmp.eq.s32.totalorder %s437_s23, 1 }
   0xd   : > { %p469_p10 = scmp.lt.s32.totalorder %s605_s21, 2  ;;  %s187_s7 = sand.u32 1, %s601_s20  }
   0xe   : > { %p688_p11 = por %p149_p7, %p35_p0  ;;  %p692_p12 = por %p155_p8, %p41_p3 }
   0xf   : > { %s455_s8 = sshll.u32 %s605_s21, 3  ;;  %s440_s9 = sshll.u32 %s187_s7, 3 }
  0x10   : > { %s196_s12 = scalar_lea.hbm %s781_s0, %s455_s8  ;;  %s191_s14 = scalar_lea.vmem [#allocation2], %s440_s9 }
  0x11   : > { %s198_s13 = sshll.u32 %s196_s12, 4  ;;  %s200_s15 = sshll.u32 %s191_s14, 4  ;;  %s199_s13 = int_to_ptr.hbm [resolvable:$true] %s198_s13  ;;  %s201_s15 = int_to_ptr.vmem [resolvable:$true] %s200_s15 }
  0x12   : > { %p703_p13 = pnand %p469_p10, %p677_p5  ;;  %p443_p0 = scmp.ge.s32.totalorder %s605_s21, 1 }
  0x13   : > { %p205_p1 = scmp.lt.s32.totalorder %s605_s21, 3  ;;  %s188_s17 = scalar_lea.sflag [#allocation3], %s187_s7 }
  0x14   : > { %s509_s23 = sshra.s32 %s199_s13, 4  ;;  %p513_p3 = pneg %p703_p13  ;;  %s510_s23 = int_to_ptr.hbm [resolvable:$true] %s509_s23 }
  0x15   : > { %s511_s25 = scalar_lea.hbm %s510_s23, 8  ;;  %s516_s28 = scalar_lea.hbm %s781_s0, 16 }
  0x16   : > { %p512_p2 = scmp.ne.s32.totalorder %s510_s23, %s511_s25  ;;  %p517_p5 = scmp.lt.s32.totalorder %s510_s23, %s781_s0 }
  0x17   : > { %p518_p8 = scmp.lt.s32.totalorder %s516_s28, %s511_s25 }
  0x18   : > { %p514_p4 = pnand %p513_p3, %p512_p2 }
  0x19   : > { %p519_p10 = por %p518_p8, %p517_p5 }
  0x1a   : > { %p515_p7 = pneg %p514_p4 }
  0x1c   : > { %p520_p9 = pnand %p519_p10, %p515_p7 }
  0x1e   : > { %523 = shalt.err (!%p520_p9)
}
  0x1f   : > { %464 = dma.hbm_to_vmem [thread:$0]  (!%p703_p13), %s199_s13, 128, %s201_s15, %s188_s17  }
  0x20   : > { %p206_p2 = pnand %p443_p0, %p205_p1 }
  0x21   : > { %s724_s7 = sand.u32 (!%p206_p2), 1, %s597_s19  }
  0x22   : > { %209 = sbr.rel (%p206_p2) target bundleno = 582 (0x246), region = 40  ;;  %s444_s11 = sshll.u32 (!%p206_p2), %s724_s7, 3 }
  0x23   : > { %s212_s12 = scalar_lea.sflag (!%p206_p2), [#allocation3], %s724_s7  ;;  %s215_s14 = scalar_lea.vmem (!%p206_p2), [#allocation2], %s444_s11 }
  0x27   : > { %584 = dma.done.wait (%p681_p6), %s212_s12, 128  }
  0x28   : > { %586 = vsyncadd (%p681_p6), %s212_s12, 4294967168  ;;  %v243_v0 = vld [vmem:[%s215_s14] sm:$0xff]  ;;  %vm250_vm0 = vcmask 1043456   ;;  %v257_v6 = vld [vmem:[%s782_s1] sm:$0xf]  ;;  %v260_v7 = vlaneseq  ;;  %vm263_vm1 = vcmask 31744  }
  0x29   : > { %245 = vst [vmem:[#allocation1] ss:$2 sm:$0xff] %v243_v0  ;;  %446 = vmatpush.msk.msra.mxu0 %vm250_vm0, %v257_v6  ;;  %v290_v12 = vld [vmem:[%s784_s3] sm:$0xff]  ;;  %vm292_vm2 = vcmask 64512   ;;  %v607_v35 = vmov 839922192  }
  0x2a   : > { %v261_v8 = vand.u32 127, %v260_v7  ;;  %311 = vmatpush.msra.mxu1 %v290_v12  ;;  %v258_v13 = vld [vmem:[%s783_s2] sm:$0x1]  ;;  %v337_v17 = vshrl.u32 %v260_v7, 7  ;;  %v344_v36 = vunpack.c.l.s4 %v607_v35  ;;  %s456_s8 = sshll.u32 %s659_s22, 3  ;;  %s242_s12 = scalar_lea.vmem [#allocation5], %s444_s11 }
  0x2b   : > { %v291_v18 = vld [vmem:[%s785_s4] sm:$0x1]  ;;  %s362_s10 = scalar_lea.hbm %s786_s5, %s456_s8  ;;  %s364_s14 = sshll.u32 %s242_s12, 4  ;;  %s365_s14 = int_to_ptr.vmem [resolvable:$true] %s364_s14 }
  0x2c   : > { %504 = vset.pattern.permute.xlu0 %v337_v17  ;;  %v345_v37 = vunpack.c.0.s8 %v344_v36  ;;  %s366_s13 = sshll.u32 %s362_s10, 4  ;;  %s351_s15 = scalar_lea.sflag [#allocation4], %s724_s7  ;;  %s367_s13 = int_to_ptr.hbm [resolvable:$true] %s366_s13 }
  0x2d   : > { %s553_s29 = sshra.s32 %s367_s13, 4  ;;  %s559_s23 = scalar_lea.hbm %s786_s5, 16  ;;  %s554_s29 = int_to_ptr.hbm [resolvable:$true] %s553_s29 }
  0x2e   : > { %s555_s22 = scalar_lea.hbm %s554_s29, 8  ;;  %p560_p0 = scmp.lt.s32.totalorder %s554_s29, %s786_s5 }
  0x2f   : > { %p556_p6 = scmp.ne.s32.totalorder %s554_s29, %s555_s22  ;;  %p561_p1 = scmp.lt.s32.totalorder %s559_s23, %s555_s22 }
  0x30   : > { %v246_v1 = vld.sshfl [vmem:[#allocation1] sm:$0xff pattern:$0x75316420]  ;;  %v247_v2 = vld.sshfl [vmem:[#allocation1 + $0x8] sm:$0xff pattern:$0x75316420] }
  0x31   : > { %v251_v3 = vsel %vm250_vm0, %v246_v1, 0.0  ;;  %v252_v4 = vsel %vm250_vm0, %v247_v2, 0.0  ;;  %p557_p9 = pnand %p556_p6, %p688_p11  ;;  %p562_p3 = por %p561_p1, %p560_p0 }
  0x32   : > { %v253_v5 = vadd.f32 %v252_v4, %v251_v3 }
  0x33   : > { %p558_p13 = pneg %p557_p9 }
  0x34   : > { %254 = vadd.xlane.f32.xlu0 %v253_v5 }
  0x35   : > { %p563_p4 = pnand %p562_p3, %p558_p13 }
  0xa7   : > { %v255_v9 = vpop.xlane.xlu0 %254 }
  0xa8   : > { %v256_v10 = vmul.f32 0.00390625, %v255_v9 }
  0xaa   : > { %v262_v11 = vperm.slane %v256_v10, %v261_v8 }
  0xac   : > { %447 = vmatmul.msk.f32.vlgmr.msra.gmra.mxu0 %vm263_vm1, %v262_v11 }
 0x129   : > { %v286_v14 = vpop.f32.mrf.mxu0 }
 0x12a   : > { %v287_v15 = vadd.f32 %v286_v14, %v258_v13 }
 0x12c   : > { %v289_v16 = vmax.f32 %v287_v15, 0.0 }
 0x12e   : > { %448 = vmatmul.msk.f32.vlgmr.msra.gmra.mxu1 %vm292_vm2, %v289_v16 }
 0x1ab   : > { %v313_v19 = vpop.f32.mrf.mxu1 }
 0x1ac   : > { %v314_v20 = vadd.f32 %v313_v19, %v291_v18 }
 0x1ae   : > { %v449_v21 = vmul.f32 -1.442695, %v314_v20 }
 0x1b0   : > { %505 = vpow2.f32 %v449_v21 }
 0x1b6   : > { %v506_v22 = vpop.eup %505 }
 0x1b7   : > { %v319_v23 = vadd.f32 1.0, %v506_v22 }
 0x1b9   : > { %507 = vrcp.f32 %v319_v23  ;;  %v331_v27 = vand.u32 2147483648, %v319_v23  ;;  %v329_v29 = vand.u32 2147483647, %v319_v23  ;;  %vm325_vm4 = vweird.f32 %v319_v23 }
 0x1bb   : > { %v332_v31 = vor.u32 1.1754944e-38, %v331_v27  ;;  %vm330_vm6 = vcmp.eq.f32.partialorder %v329_v29, 8.507059e+37 }
 0x1bf   : > { %v508_v24 = vpop.eup %507 }
 0x1c0   : > { %v321_v25 = vmul.f32 %v508_v24, %v319_v23  ;;  %vm326_vm3 = vweird.f32 %v508_v24 }
 0x1c1   : > { %vm327_vm5 = vmor %vm325_vm4, %vm326_vm3 }
 0x1c2   : > { %v322_v26 = vsub.f32 1.0, %v321_v25 }
 0x1c4   : > { %v323_v28 = vmul.f32 %v508_v24, %v322_v26 }
 0x1c6   : > { %v324_v30 = vadd.f32 %v508_v24, %v323_v28 }
 0x1c8   : > { %v328_v32 = vsel %vm327_vm5, %v508_v24, %v324_v30 }
 0x1c9   : > { %v333_v33 = vsel %vm330_vm6, %v332_v31, %v328_v32 }
 0x1ca   : > { %v335_v34 = vperm.slane %v333_v33, 0 }
 0x1cc   : > { %340 = vperm.xlu0 %504, %v335_v34  }
 0x23e   : > { %v341_v38 = vpop.permute.xlu0 %340 }
 0x23f   : > { %v346_v39 = vperm.slane %v341_v38, %v345_v37 }
 0x241   : > { %v348_v40 = vmul.f32 %v346_v39, %v243_v0 }
 0x243   : > { %349 = vst [vmem:[%s242_s12] sm:$0xff] %v348_v40 }
 0x244   : > { %566 = shalt.err (!%p563_p4)
}
 0x245   : > { %459 = dma.vmem_to_hbm [thread:$0]  (%p688_p11), %s365_s14, 128, %s367_s13, %s351_s15  }
 0x246 PF: > { %s378_s7 = sand.u32 1, %s593_s18   ;;  %p792_p7 = scmp.ge.s32.totalorder %s605_s21, 2 }
 0x247   : > { %s379_s26 = scalar_lea.sflag [#allocation4], %s378_s7 }
 0x248   : > { %p466_p5 = pnand %p792_p7, %p692_p12 }
 0x24a   : > { %p467_p8 = pneg %p466_p5 }
 0x24c   : > { %588 = dma.done.wait (%p467_p8), %s379_s26, 128  }
 0x24d   : > { %590 = vsyncadd (%p467_p8), %s379_s26, 4294967168  ;;  %p18_p10 = scmp.ge.s32.totalorder %s663_s24, 4   ;;  %s793_s18 = smov %s597_s19 }
 0x24e   : > { %s794_s19 = smov %s601_s20  ;;  %s795_s20 = smov %s675_s27 }
 0x24f   : > { %s796_s21 = smov %s663_s24  ;;  %20 = sbr.rel (!%p18_p10) target bundleno = 5 (0x5), region = 85 }
 0x254   :  { %385 = vsyncpa [#allocation3], 1 }
 0x255   :  { %387 = vsyncpa [#allocation3 + $0x1], 1 }
 0x256   :  { %388 = vsyncpa [#allocation4], 1 }
 0x257   :  { %390 = vsyncpa [#allocation4 + $0x1], 1 }

</bundles_post_ra>
